<compile_context>
chip_gen: v7x
topology: tpu7x:2x2x1
jax: 0.10.0
libtpu: 0.0.40
codegen_flags: <defaults>
</compile_context>

<pallas_src>
import functools

import numpy as np
import jax
import jax.numpy as jnp
from jax.experimental import pallas as pl
from jax.experimental.pallas import tpu as pltpu

_NEG_BIG = -float(np.finfo(np.float32).max)  # matches -torch.finfo(torch.float).max


def _round_up(x, m):
    return ((x + m - 1) // m) * m


def _choose_tiles(s_q, s_k):
    # Single full-extent tile for short sequences (block == full dim is always
    # legal); otherwise MXU-aligned tiles sized for the smallest (v7x) VMEM.
    tq = s_q if s_q <= 256 else 256
    tk = s_k if s_k <= 512 else 512
    return tq, tk


def _sdpa_kernel(*refs, scale, compute_dtype, has_mask, s_k_valid, tk):
    if has_mask:
        q_ref, k_ref, v_ref, mask_ref, o_ref, m_scr, l_scr, acc_scr = refs
    else:
        q_ref, k_ref, v_ref, o_ref, m_scr, l_scr, acc_scr = refs
        mask_ref = None

    ki = pl.program_id(2)

    @pl.when(ki == 0)
    def _init():
        m_scr[...] = jnp.full_like(m_scr, _NEG_BIG)
        l_scr[...] = jnp.zeros_like(l_scr)
        acc_scr[...] = jnp.zeros_like(acc_scr)

    q = q_ref[0]  # (tq, d_k) compute_dtype
    k = k_ref[0]  # (tk, d_k) compute_dtype

    # q @ k^T without an explicit transpose: contract the last dim of both
    # operands so the MXU is fed directly (XLU stays free for the reductions).
    s = jax.lax.dot_general(
        q, k,
        dimension_numbers=(((1,), (1,)), ((), ())),
        preferred_element_type=jnp.float32,
    ) * scale  # (tq, tk) f32

    if has_mask:
        s = jnp.where(mask_ref[0] != 0, _NEG_BIG, s)
    elif s_k_valid is not None:
        # No user mask but the K axis was padded: mask the padded columns.
        col = ki * tk + jax.lax.broadcasted_iota(jnp.int32, s.shape, 1)
        s = jnp.where(col < s_k_valid, s, _NEG_BIG)

    # Online (flash-style) softmax update, all in f32.
    m_prev = m_scr[...]                                            # (tq, 1)
    m_new = jnp.maximum(m_prev, jnp.max(s, axis=-1, keepdims=True))
    alpha = jnp.exp(m_prev - m_new)
    p = jnp.exp(s - m_new)                                         # (tq, tk) f32
    l_scr[...] = alpha * l_scr[...] + jnp.sum(p, axis=-1, keepdims=True)
    pv = jnp.dot(p.astype(compute_dtype), v_ref[0],
                 preferred_element_type=jnp.float32)               # (tq, d_v)
    acc_scr[...] = alpha * acc_scr[...] + pv
    m_scr[...] = m_new

    @pl.when(ki == pl.num_programs(2) - 1)
    def _finalize():
        approx = jnp.dtype(compute_dtype) != jnp.dtype(jnp.float32)
        inv_l = pl.reciprocal(l_scr[...], approx=approx)
        o_ref[0] = (acc_scr[...] * inv_l).astype(o_ref.dtype)


def scaled_dot_product_attention(q, k, v, mask=None, *,
                                 compute_dtype=jnp.bfloat16,
                                 out_dtype=None):
    """Pallas TPU implementation of ScaledDotProductAttention.forward.

    q: (B, S_q, d_k), k: (B, S_k, d_k), v: (B, S_k, d_v)
    mask: optional (B, S_q, S_k); True/nonzero => masked out.
    compute_dtype: dtype of the MXU operands (softmax math stays f32).
    out_dtype: output dtype; defaults to q.dtype.
    """
    B, S_q, d_k = q.shape
    Bk, S_k, d_k2 = k.shape
    assert d_k == d_k2 and B == Bk
    d_v = v.shape[-1]

    if mask is not None and mask.ndim != 3:
        raise ValueError(
            "mask.dim != attention_weight.dim, mask.dim={}, attention_weight.dim=3"
            .format(mask.ndim))

    out_dtype = q.dtype if out_dtype is None else out_dtype
    has_mask = mask is not None

    tq, tk = _choose_tiles(S_q, S_k)
    S_qp = _round_up(S_q, tq)
    S_kp = _round_up(S_k, tk)

    # No f32 upcast: ship operands to HBM/VMEM in the (bf16) compute dtype.
    qc = q.astype(compute_dtype)
    kc = k.astype(compute_dtype)
    vc = v.astype(compute_dtype)
    if S_qp != S_q:
        qc = jnp.pad(qc, ((0, 0), (0, S_qp - S_q), (0, 0)))
    if S_kp != S_k:
        kc = jnp.pad(kc, ((0, 0), (0, S_kp - S_k), (0, 0)))
        vc = jnp.pad(vc, ((0, 0), (0, S_kp - S_k), (0, 0)))

    inputs = [qc, kc, vc]
    in_specs = [
        pl.BlockSpec((1, tq, d_k), lambda b, qi, ki: (b, qi, 0)),
        pl.BlockSpec((1, tk, d_k), lambda b, qi, ki: (b, ki, 0)),
        pl.BlockSpec((1, tk, d_v), lambda b, qi, ki: (b, ki, 0)),
    ]
    if has_mask:
        m8 = mask.astype(jnp.int8)  # 4x smaller than int32 on the wire
        if S_qp != S_q or S_kp != S_k:
            m8 = jnp.pad(m8, ((0, 0), (0, S_qp - S_q), (0, S_kp - S_k)),
                         constant_values=1)
        inputs.append(m8)
        in_specs.append(pl.BlockSpec((1, tq, tk), lambda b, qi, ki: (b, qi, ki)))

    n_q = S_qp // tq
    n_k = S_kp // tk
    grid = (B, n_q, n_k)

    kernel = functools.partial(
        _sdpa_kernel,
        scale=1.0 / float(np.sqrt(float(d_k))),
        compute_dtype=compute_dtype,
        has_mask=has_mask,
        s_k_valid=(S_k if (not has_mask and S_kp != S_k) else None),
        tk=tk,
    )

    # Cost estimate (QK^T + PV flops, exp count, HBM bytes).
    c_isz = jnp.dtype(compute_dtype).itemsize
    o_isz = jnp.dtype(out_dtype).itemsize
    flops = 2 * B * S_qp * S_kp * (d_k + d_v)
    transcendentals = B * S_qp * S_kp
    bytes_accessed = (B * S_qp * d_k + B * S_kp * (d_k + d_v)) * c_isz \
        + (B * S_qp * S_kp if has_mask else 0) + B * S_qp * d_v * o_isz

    # Scoped-VMEM budget from the tile sizes (double-buffered tiles + scratch
    # + f32 score/prob temporaries), clamped well under v7x's 64 MiB physical.
    tile_in_bytes = (tq * d_k + tk * d_k + tk * d_v) * c_isz \
        + (tq * tk if has_mask else 0)
    tile_out_bytes = tq * d_v * o_isz
    scratch_bytes = (2 * tq + tq * d_v) * 4
    tmp_bytes = 8 * tq * tk * 4
    vmem_est = 2 * (tile_in_bytes + tile_out_bytes) + scratch_bytes + tmp_bytes
    vmem_limit = int(min(48 * 1024 * 1024, max(16 * 1024 * 1024, 2 * vmem_est)))

    out = pl.pallas_call(
        kernel,
        out_shape=jax.ShapeDtypeStruct((B, S_qp, d_v), out_dtype),
        grid_spec=pltpu.PrefetchScalarGridSpec(
            num_scalar_prefetch=0,
            grid=grid,
            in_specs=in_specs,
            out_specs=pl.BlockSpec((1, tq, d_v), lambda b, qi, ki: (b, qi, 0)),
            scratch_shapes=[
                pltpu.VMEM((tq, 1), jnp.float32),    # running max
                pltpu.VMEM((tq, 1), jnp.float32),    # running denominator
                pltpu.VMEM((tq, d_v), jnp.float32),  # output accumulator
            ],
        ),
        compiler_params=pltpu.CompilerParams(
            dimension_semantics=("parallel", "parallel", "arbitrary"),
            vmem_limit_bytes=vmem_limit,
        ),
        cost_estimate=pl.CostEstimate(
            flops=int(flops),
            transcendentals=int(transcendentals),
            bytes_accessed=int(bytes_accessed),
        ),
    )(*inputs)

    if S_qp != S_q:
        out = out[:, :S_q, :]
    return out


def _reference(q, k, v, mask=None):
    d_k = q.shape[-1]
    scores = jnp.einsum("bqd,bkd->bqk", q, k,
                        precision=jax.lax.Precision.HIGHEST) / np.sqrt(float(d_k))
    if mask is not None:
        scores = jnp.where(mask, _NEG_BIG, scores)
    w = jax.nn.softmax(scores, axis=2)
    return jnp.einsum("bqk,bkd->bqd", w, v, precision=jax.lax.Precision.HIGHEST)


if __name__ == "__main__":
    key = jax.random.PRNGKey(0)
    kq, kk, kv, km = jax.random.split(key, 4)

    # Small shapes matching the module's expected use.
    B, S, d_k, d_v = 2, 8, 32, 32
    q = jax.random.normal(kq, (B, S, d_k), dtype=jnp.float32)
    k = jax.random.normal(kk, (B, S, d_k), dtype=jnp.float32)
    v = jax.random.normal(kv, (B, S, d_v), dtype=jnp.float32)
    mask = jax.random.bernoulli(km, p=0.2, shape=(B, S, S))
    ref = _reference(q, k, v, mask)

    # f32-compute path (closest to the PyTorch module's numerics).
    out_f32 = jax.block_until_ready(
        scaled_dot_product_attention(q, k, v, mask, compute_dtype=jnp.float32))
    np.testing.assert_allclose(np.asarray(out_f32), np.asarray(ref),
                               rtol=1e-3, atol=1e-3)

    # Default bf16 MXU path (f32 accumulation / softmax).
    out_bf = jax.block_until_ready(scaled_dot_product_attention(q, k, v, mask))
    np.testing.assert_allclose(np.asarray(out_bf), np.asarray(ref),
                               rtol=5e-2, atol=5e-2)

    # mask=None specialization (no mask tensor is materialized or DMA'd).
    out_nm = jax.block_until_ready(
        scaled_dot_product_attention(q, k, v, compute_dtype=jnp.float32))
    np.testing.assert_allclose(np.asarray(out_nm), np.asarray(_reference(q, k, v)),
                               rtol=1e-3, atol=1e-3)

    # Larger shapes: exercise the tiled flash grid + Q/K padding paths.
    B2, Sq2, Sk2, d2 = 2, 320, 640, 64
    q2 = jax.random.normal(kq, (B2, Sq2, d2), dtype=jnp.float32)
    k2 = jax.random.normal(kk, (B2, Sk2, d2), dtype=jnp.float32)
    v2 = jax.random.normal(kv, (B2, Sk2, d2), dtype=jnp.float32)
    mask2 = jax.random.bernoulli(km, p=0.15, shape=(B2, Sq2, Sk2))

    out2 = jax.block_until_ready(
        scaled_dot_product_attention(q2, k2, v2, mask2, compute_dtype=jnp.float32))
    np.testing.assert_allclose(np.asarray(out2),
                               np.asarray(_reference(q2, k2, v2, mask2)),
                               rtol=1e-3, atol=1e-3)

    out2_nm = jax.block_until_ready(scaled_dot_product_attention(q2, k2, v2))
    np.testing.assert_allclose(np.asarray(out2_nm),
                               np.asarray(_reference(q2, k2, v2)),
                               rtol=5e-2, atol=5e-2)

    print("KERNEL_OK")
</pallas_src>

<mosaic_0001>
module attributes {stable_mosaic.version = 11 : i64} {
  func.func @_sdpa_kernel(%arg0: i32, %arg1: i32, %arg2: i32, %arg3: memref<1x8x32xf32, #tpu.memory_space<vmem>>, %arg4: memref<1x8x32xf32, #tpu.memory_space<vmem>>, %arg5: memref<1x8x32xf32, #tpu.memory_space<vmem>>, %arg6: memref<1x8x8xi8, #tpu.memory_space<vmem>>, %arg7: memref<1x8x32xf32, #tpu.memory_space<vmem>>, %arg8: memref<8x1xf32, #tpu.memory_space<vmem>>, %arg9: memref<8x1xf32, #tpu.memory_space<vmem>>, %arg10: memref<8x32xf32, #tpu.memory_space<vmem>>) attributes {dimension_semantics = [#tpu.dimension_semantics<parallel>, #tpu.dimension_semantics<parallel>, #tpu.dimension_semantics<arbitrary>], iteration_bounds = array<i64: 2, 1, 1>, scalar_prefetch = 0 : i64, scratch_operands = 3 : i64, tpu.core_type = #tpu.core_type<tc>, window_params = [{transform_indices = @transform_0, window_bounds = array<i64: 1, 8, 32>}, {transform_indices = @transform_1, window_bounds = array<i64: 1, 8, 32>}, {transform_indices = @transform_2, window_bounds = array<i64: 1, 8, 32>}, {transform_indices = @transform_3, window_bounds = array<i64: 1, 8, 8>}, {transform_indices = @transform_4, window_bounds = array<i64: 1, 8, 32>}]} {
    %c0_i32 = arith.constant 0 : i32
    %0 = arith.cmpi eq, %arg2, %c0_i32 : i32
    %1 = arith.extui %0 : i1 to i32
    %c0_i32_0 = arith.constant 0 : i32
    %2 = arith.cmpi ne, %1, %c0_i32_0 : i32
    scf.if %2 {
      %cst_31 = arith.constant -3.40282347E+38 : f32
      %43 = vector.broadcast %cst_31 : f32 to vector<8x1xf32>
      %c0_32 = arith.constant 0 : index
      %c0_33 = arith.constant 0 : index
      %44 = vector.load %arg8[%c0_32, %c0_33] : memref<8x1xf32, #tpu.memory_space<vmem>>, vector<8x1xf32>
      tpu.vector_store %arg8[%c0_32, %c0_33], %43 {strides = array<i32>} : memref<8x1xf32, #tpu.memory_space<vmem>>, vector<8x1xf32>,
      %cst_34 = arith.constant 0.000000e+00 : f32
      %45 = vector.broadcast %cst_34 : f32 to vector<8x1xf32>
      %c0_35 = arith.constant 0 : index
      %c0_36 = arith.constant 0 : index
      %46 = vector.load %arg9[%c0_35, %c0_36] : memref<8x1xf32, #tpu.memory_space<vmem>>, vector<8x1xf32>
      tpu.vector_store %arg9[%c0_35, %c0_36], %45 {strides = array<i32>} : memref<8x1xf32, #tpu.memory_space<vmem>>, vector<8x1xf32>,
      %cst_37 = arith.constant 0.000000e+00 : f32
      %47 = vector.broadcast %cst_37 : f32 to vector<8x32xf32>
      %c0_38 = arith.constant 0 : index
      %c0_39 = arith.constant 0 : index
      %48 = vector.load %arg10[%c0_38, %c0_39] : memref<8x32xf32, #tpu.memory_space<vmem>>, vector<8x32xf32>
      tpu.vector_store %arg10[%c0_38, %c0_39], %47 {strides = array<i32>} : memref<8x32xf32, #tpu.memory_space<vmem>>, vector<8x32xf32>,
    } else {
    }
    %c0 = arith.constant 0 : index
    %c0_1 = arith.constant 0 : index
    %c0_2 = arith.constant 0 : index
    %3 = vector.load %arg3[%c0, %c0_1, %c0_2] : memref<1x8x32xf32, #tpu.memory_space<vmem>>, vector<1x8x32xf32>
    %4 = vector.shape_cast %3 : vector<1x8x32xf32> to vector<8x32xf32>
    %c0_3 = arith.constant 0 : index
    %c0_4 = arith.constant 0 : index
    %c0_5 = arith.constant 0 : index
    %5 = vector.load %arg4[%c0_3, %c0_4, %c0_5] : memref<1x8x32xf32, #tpu.memory_space<vmem>>, vector<1x8x32xf32>
    %6 = vector.shape_cast %5 : vector<1x8x32xf32> to vector<8x32xf32>
    %cst = arith.constant dense<0.000000e+00> : vector<8x8xf32>
    %7 = tpu.matmul %4, %6, %cst {dimension_numbers = #tpu.dot_dimension_numbers<[1], [1], [0], [0], [0, 0, 1, 0], [], []>} : vector<8x32xf32>, vector<8x32xf32>, vector<8x8xf32> -> vector<8x8xf32>
    %cst_6 = arith.constant 0.176776692 : f32
    %8 = vector.broadcast %cst_6 : f32 to vector<8x8xf32>
    %9 = arith.mulf %7, %8 : vector<8x8xf32>
    %c0_7 = arith.constant 0 : index
    %c0_8 = arith.constant 0 : index
    %c0_9 = arith.constant 0 : index
    %10 = vector.load %arg6[%c0_7, %c0_8, %c0_9] : memref<1x8x8xi8, #tpu.memory_space<vmem>>, vector<1x8x8xi8>
    %11 = vector.shape_cast %10 : vector<1x8x8xi8> to vector<8x8xi8>
    %c0_i8 = arith.constant 0 : i8
    %12 = vector.broadcast %c0_i8 : i8 to vector<8x8xi8>
    %13 = arith.cmpi ne, %11, %12 : vector<8x8xi8>
    %cst_10 = arith.constant -3.40282347E+38 : f32
    %14 = vector.broadcast %cst_10 : f32 to vector<8x8xf32>
    %15 = arith.select %13, %14, %9 : vector<8x8xi1>, vector<8x8xf32>
    %c0_11 = arith.constant 0 : index
    %c0_12 = arith.constant 0 : index
    %16 = vector.load %arg8[%c0_11, %c0_12] : memref<8x1xf32, #tpu.memory_space<vmem>>, vector<8x1xf32>
    %cst_13 = arith.constant dense<0xFF800000> : vector<8xf32>
    %17 = vector.multi_reduction <maximumf>, %15, %cst_13 [1] : vector<8x8xf32> to vector<8xf32>
    %18 = vector.shape_cast %17 : vector<8xf32> to vector<8x1xf32>
    %19 = arith.maximumf %16, %18 : vector<8x1xf32>
    %20 = arith.subf %16, %19 : vector<8x1xf32>
    %21 = math.exp %20 : vector<8x1xf32>
    %22 = vector.broadcast %19 : vector<8x1xf32> to vector<8x8xf32>
    %23 = arith.subf %15, %22 : vector<8x8xf32>
    %24 = math.exp %23 : vector<8x8xf32>
    %c0_14 = arith.constant 0 : index
    %c0_15 = arith.constant 0 : index
    %25 = vector.load %arg9[%c0_14, %c0_15] : memref<8x1xf32, #tpu.memory_space<vmem>>, vector<8x1xf32>
    %26 = arith.mulf %21, %25 : vector<8x1xf32>
    %cst_16 = arith.constant dense<0.000000e+00> : vector<8xf32>
    %27 = vector.multi_reduction <add>, %24, %cst_16 [1] : vector<8x8xf32> to vector<8xf32>
    %28 = vector.shape_cast %27 : vector<8xf32> to vector<8x1xf32>
    %29 = arith.addf %26, %28 : vector<8x1xf32>
    %c0_17 = arith.constant 0 : index
    %c0_18 = arith.constant 0 : index
    %30 = vector.load %arg9[%c0_17, %c0_18] : memref<8x1xf32, #tpu.memory_space<vmem>>, vector<8x1xf32>
    tpu.vector_store %arg9[%c0_17, %c0_18], %29 {strides = array<i32>} : memref<8x1xf32, #tpu.memory_space<vmem>>, vector<8x1xf32>,
    %c0_19 = arith.constant 0 : index
    %c0_20 = arith.constant 0 : index
    %c0_21 = arith.constant 0 : index
    %31 = vector.load %arg5[%c0_19, %c0_20, %c0_21] : memref<1x8x32xf32, #tpu.memory_space<vmem>>, vector<1x8x32xf32>
    %32 = vector.shape_cast %31 : vector<1x8x32xf32> to vector<8x32xf32>
    %cst_22 = arith.constant dense<0.000000e+00> : vector<8x32xf32>
    %33 = tpu.matmul %24, %32, %cst_22 {dimension_numbers = #tpu.dot_dimension_numbers<[1], [0], [0], [1], [0, 0, 1, 1], [], []>} : vector<8x8xf32>, vector<8x32xf32>, vector<8x32xf32> -> vector<8x32xf32>
    %c0_23 = arith.constant 0 : index
    %c0_24 = arith.constant 0 : index
    %34 = vector.load %arg10[%c0_23, %c0_24] : memref<8x32xf32, #tpu.memory_space<vmem>>, vector<8x32xf32>
    %35 = vector.broadcast %21 : vector<8x1xf32> to vector<8x32xf32>
    %36 = arith.mulf %35, %34 : vector<8x32xf32>
    %37 = arith.addf %36, %33 : vector<8x32xf32>
    %c0_25 = arith.constant 0 : index
    %c0_26 = arith.constant 0 : index
    %38 = vector.load %arg10[%c0_25, %c0_26] : memref<8x32xf32, #tpu.memory_space<vmem>>, vector<8x32xf32>
    tpu.vector_store %arg10[%c0_25, %c0_26], %37 {strides = array<i32>} : memref<8x32xf32, #tpu.memory_space<vmem>>, vector<8x32xf32>,
    %c0_27 = arith.constant 0 : index
    %c0_28 = arith.constant 0 : index
    %39 = vector.load %arg8[%c0_27, %c0_28] : memref<8x1xf32, #tpu.memory_space<vmem>>, vector<8x1xf32>
    tpu.vector_store %arg8[%c0_27, %c0_28], %19 {strides = array<i32>} : memref<8x1xf32, #tpu.memory_space<vmem>>, vector<8x1xf32>,
    %c0_i32_29 = arith.constant 0 : i32
    %40 = arith.cmpi eq, %arg2, %c0_i32_29 : i32
    %41 = arith.extui %40 : i1 to i32
    %c0_i32_30 = arith.constant 0 : i32
    %42 = arith.cmpi ne, %41, %c0_i32_30 : i32
    scf.if %42 {
      %c0_31 = arith.constant 0 : index
      %c0_32 = arith.constant 0 : index
      %43 = vector.load %arg9[%c0_31, %c0_32] : memref<8x1xf32, #tpu.memory_space<vmem>>, vector<8x1xf32>
      %44 = tpu.reciprocal %43 : vector<8x1xf32> -> vector<8x1xf32>
      %c0_33 = arith.constant 0 : index
      %c0_34 = arith.constant 0 : index
      %45 = vector.load %arg10[%c0_33, %c0_34] : memref<8x32xf32, #tpu.memory_space<vmem>>, vector<8x32xf32>
      %46 = vector.broadcast %44 : vector<8x1xf32> to vector<8x32xf32>
      %47 = arith.mulf %45, %46 : vector<8x32xf32>
      %c0_35 = arith.constant 0 : index
      %c0_36 = arith.constant 0 : index
      %c0_37 = arith.constant 0 : index
      %48 = vector.load %arg7[%c0_35, %c0_36, %c0_37] : memref<1x8x32xf32, #tpu.memory_space<vmem>>, vector<1x8x32xf32>
      %49 = vector.shape_cast %48 : vector<1x8x32xf32> to vector<8x32xf32>
      %50 = vector.shape_cast %47 : vector<8x32xf32> to vector<1x8x32xf32>
      tpu.vector_store %arg7[%c0_35, %c0_36, %c0_37], %50 {strides = array<i32>} : memref<1x8x32xf32, #tpu.memory_space<vmem>>, vector<1x8x32xf32>,
    } else {
    }
    return
  }
  func.func @transform_0(%arg0: i32, %arg1: i32, %arg2: i32) -> (i32, i32, i32) {
    %c0_i32 = arith.constant 0 : i32
    %c0_i32_0 = arith.constant 0 : i32
    return %arg0, %arg1, %c0_i32 : i32, i32, i32
  }
  func.func @transform_1(%arg0: i32, %arg1: i32, %arg2: i32) -> (i32, i32, i32) {
    %c0_i32 = arith.constant 0 : i32
    %c0_i32_0 = arith.constant 0 : i32
    return %arg0, %arg2, %c0_i32 : i32, i32, i32
  }
  func.func @transform_2(%arg0: i32, %arg1: i32, %arg2: i32) -> (i32, i32, i32) {
    %c0_i32 = arith.constant 0 : i32
    %c0_i32_0 = arith.constant 0 : i32
    return %arg0, %arg2, %c0_i32 : i32, i32, i32
  }
  func.func @transform_3(%arg0: i32, %arg1: i32, %arg2: i32) -> (i32, i32, i32) {
    %c0_i32 = arith.constant 0 : i32
    return %arg0, %arg1, %arg2 : i32, i32, i32
  }
  func.func @transform_4(%arg0: i32, %arg1: i32, %arg2: i32) -> (i32, i32, i32) {
    %c0_i32 = arith.constant 0 : i32
    %c0_i32_0 = arith.constant 0 : i32
    return %arg0, %arg1, %c0_i32 : i32, i32, i32
  }
}

</mosaic_0001>

<bundles_post_ra>
// kernel: tpu_custom_call.1
= control target key start
LH: loop header
LB: loop body
LE: loop exit
PB: predicated region body
PF: predicated region fallthrough
CT: control target
= control target key end

     0   :  { %s1346_s0 = inlined_call_operand.hbm [shape: f32[2,8,32], index: 0, kind: input, shape index: {}]   ;;  %s1347_s1 = inlined_call_operand.hbm [shape: f32[2,8,32], index: 1, kind: input, shape index: {}]   ;;  %s1348_s2 = inlined_call_operand.hbm [shape: f32[2,8,32], index: 2, kind: input, shape index: {}]   ;;  %s1349_s3 = inlined_call_operand.vmem [shape: s8[2,8,8], index: 3, kind: input, shape index: {}]   ;;  %s1350_s4 = inlined_call_operand.hbm [shape: f32[2,8,32], index: 4, kind: output, shape index: {}]  }
   0x1   :  { %1359 = sst [smem:[#allocation19_spill]] %s1347_s1 }
   0x2   :  { %9 = vsyncpa [#allocation6], 0 }
   0x3   :  { %11 = vsyncpa [#allocation6 + $0x1], 0 }
   0x4   :  { %12 = vsyncpa [#allocation9], 0 }
   0x5   :  { %14 = vsyncpa [#allocation9 + $0x1], 0 }
   0x6   :  { %15 = vsyncpa [#allocation7], 0 }
   0x7   :  { %17 = vsyncpa [#allocation7 + $0x1], 0  ;;  %s1065_s15 = smov 0   ;;  %s1067_s16 = smov 0  }
   0x8   :  { %s1069_s17 = smov 0   ;;  %s1071_s18 = smov 0  }
   0x9   :  { %s1073_s19 = smov 0   ;;  %s1075_s20 = smov 0  }
   0xa LB: > { %1360 = sst [smem:[#allocation15_spill]] %s1026_s19  ;;  %s1096_s21 = sadd.s32 4294967295, %s1030_s20   ;;  %s1030_s20 = sphi %s1075_s20, %s23_s20   ;;  %s1026_s19 = sphi %s1073_s19, %s1384_s19   ;;  %s1022_s18 = sphi %s1071_s18, %s1383_s18   ;;  %s1018_s17 = sphi %s1069_s17, %s1387_s17   ;;  %s1014_s16 = sphi %s1067_s16, %s1386_s16   ;;  %s1010_s15 = sphi %s1065_s15, %s1385_s15  }
   0xb   : > { %1361 = sst [smem:[#allocation16_spill]] %s1030_s20  ;;  %s734_s22 = sadd.s32 4294967294, %s1030_s20  }
   0xc   : > { %s42_s23 = sadd.s32 1, %s1026_s19  ;;  %s51_s24 = sadd.s32 1, %s1018_s17 }
   0xd   : > { %p44_p0 = scmp.ge.s32.totalorder %s42_s23, 2  ;;  %p58_p1 = scmp.ne.s32.totalorder %s1018_s17, %s1014_s16 }
   0xe   : > { %p59_p2 = scmp.eq.s32.totalorder %s1030_s20, 0  ;;  %p64_p3 = scmp.ne.s32.totalorder %s1014_s16, %s1010_s15 }
   0xf   : > { %s1389_s23 = smov (%p44_p0, %s42_s23), 0  ;;  %p65_p5 = scmp.eq.s32.totalorder %s1096_s21, 0 }
  0x10   : > { %1362 = sst [smem:[#allocation17_spill]] %s1389_s23  ;;  %p1108_p4 = por %p59_p2, %p58_p1 }
  0x11   : > { %s46_s26 = ssub.s32 %s1026_s19, %s1389_s23  ;;  %p176_p6 = scmp.eq.s32.totalorder %s1096_s21, 1 }
  0x12   : > { %p49_p7 = scmp.eq.s32.totalorder %s46_s26, 0  ;;  %p1116_p8 = por %p65_p5, %p64_p3 }
  0x13   : > { %p1120_p9 = por %p176_p6, %p58_p1  ;;  %p182_p10 = scmp.eq.s32.totalorder %s734_s22, 1 }
  0x14   : > { %s1364_s27 = scalar_select %p1116_p8, 1, 0 }
  0x15   : > { %s1365_s28 = scalar_select %p1120_p9, 1, 0 }
  0x16   : > { %s1125_s29 = scalar_select %p49_p7, %s1018_s17, %s51_s24  }
  0x17   : > { %p1127_p11 = por %p182_p10, %p64_p3  ;;  %p792_p13 = scmp.lt.s32.totalorder %s1030_s20, 2 }
  0x18   : > { %1366 = sst [smem:[#allocation18_spill]] %s1125_s29  ;;  %s1351_s5 = sand.u32 1, %s1018_s17  }
  0x19   : > { %s1367_s30 = scalar_select %p1127_p11, 1, 0 }
  0x1a   : > { %s1136_s6 = sshll.u32 %s1351_s5, 3  ;;  %s1139_s7 = sshll.u32 %s1026_s19, 7 }
  0x1b   : > { %p1143_p0 = pnand %p792_p13, %p1108_p4  ;;  %s221_s9 = sand.u32 1, %s1030_s20  }
  0x1c   : > { %s1369_s1 = sld [smem:[#allocation19_spill]]  ;;  %s225_s13 = scalar_lea.vmem [#allocation8], %s1136_s6 }
  0x1d   : > { %s1368_s8 = scalar_select %p1143_p0, 1, 0 }
  0x1e   : > { %s233_s14 = sshll.u32 %s225_s13, 4  ;;  %s1159_s22 = scalar_lea.sflag [#allocation9], %s221_s9  ;;  %s1156_s14 = int_to_ptr.vmem [resolvable:$true] %s233_s14 }
  0x1f   : > { %p1165_p4 = pneg %p1143_p0 }
  0x22   : > { %s1152_s12 = scalar_lea.hbm %s1369_s1, %s1139_s7  ;;  %s859_s11 = scalar_lea.hbm %s1369_s1, 256 }
  0x23   : > { %s854_s24 = scalar_lea.hbm %s1152_s12, 128  ;;  %p860_p7 = scmp.lt.u32.totalorder %s1152_s12, %s1369_s1 }
  0x24   : > { %p855_p3 = scmp.ne.s32.totalorder %s1152_s12, %s854_s24  ;;  %p861_p10 = scmp.lt.u32.totalorder %s859_s11, %s854_s24 }
  0x25   : > { %p863_p12 = scmp.lt.u32.totalorder %s854_s24, %s1152_s12 }
  0x26   : > { %p857_p5 = pnand %p1165_p4, %p855_p3  ;;  %p862_p13 = por %p861_p10, %p860_p7 }
  0x28   : > { %p858_p6 = pneg %p857_p5  ;;  %p864_p1 = por %p863_p12, %p862_p13 }
  0x2a   : > { %p865_p2 = pnand %p864_p1, %p858_p6 }
  0x2c   : > { %868 = shalt.err (!%p865_p2)
}
  0x2d   : > { %s869_s9 = scalar_lea.vmem %s1156_s14, 128  ;;  %s1032_s26 = smov [#allocation8]  }
  0x2e   : > { %p870_p3 = scmp.ne.s32.totalorder %s1156_s14, %s869_s9  ;;  %s874_s10 = sshll.u32 %s1032_s26, 4  ;;  %s875_s10 = int_to_ptr.vmem [resolvable:$false] %s874_s10 }
  0x2f   : > { %s876_s5 = scalar_lea.vmem %s875_s10, 256  ;;  %p877_p9 = scmp.lt.s32.totalorder %s1156_s14, %s875_s10 }
  0x30   : > { %p872_p5 = pnand %p870_p3, %p1165_p4  ;;  %p878_p8 = scmp.lt.s32.totalorder %s876_s5, %s869_s9 }
  0x32   : > { %p873_p11 = pneg %p872_p5  ;;  %p879_p7 = por %p878_p8, %p877_p9 }
  0x34   : > { %p880_p10 = pnand %p879_p7, %p873_p11 }
  0x36   : > { %883 = shalt.err (!%p880_p10)
}
  0x37   : > { %784 = dma.hbm_to_vmem [thread:$0]  (!%p1143_p0), %s1152_s12, 128, %s1156_s14, %s1159_s22  }
  0x38   : > { %p1371_p12 = scmp.lt.s32.totalorder %s1030_s20, 3  ;;  %p1372_p1 = scmp.ge.s32.totalorder %s1030_s20, 1 }
  0x39   : > { %s1201_s9 = scalar_lea.hbm %s1346_s0, %s1139_s7  ;;  %s206_s26 = scalar_lea.vmem [#allocation5], %s1136_s6 }
  0x3a   : > { %p1193_p2 = pnand %p1372_p1, %p1371_p12  ;;  %s214_s10 = sshll.u32 %s206_s26, 4  ;;  %s1204_s10 = int_to_ptr.vmem [resolvable:$true] %s214_s10 }
  0x3b   : > { %s1210_s5 = scalar_lea.hbm %s1348_s2, %s1139_s7  ;;  %s1374_s1 = sand.u32 1, %s1018_s17  }
  0x3c   : > { %s1373_s24 = scalar_select %p1193_p2, 1, 0 }
  0x3d   : > { %s203_s23 = scalar_lea.sflag [#allocation6], %s1374_s1  ;;  %s884_s19 = scalar_lea.hbm %s1201_s9, 128 }
  0x3e   : > { %p885_p8 = scmp.ne.s32.totalorder %s1201_s9, %s884_s19  ;;  %s889_s29 = scalar_lea.hbm %s1346_s0, 256 }
  0x3f   : > { %p890_p6 = scmp.lt.u32.totalorder %s1201_s9, %s1346_s0  ;;  %p891_p13 = scmp.lt.u32.totalorder %s889_s29, %s884_s19 }
  0x40   : > { %p887_p9 = pnand %p885_p8, %p1165_p4  ;;  %p893_p5 = scmp.lt.u32.totalorder %s884_s19, %s1201_s9 }
  0x41   : > { %p892_p3 = por %p891_p13, %p890_p6 }
  0x42   : > { %p888_p11 = pneg %p887_p9 }
  0x43   : > { %p894_p7 = por %p893_p5, %p892_p3 }
  0x45   : > { %p895_p10 = pnand %p894_p7, %p888_p11 }
  0x47   : > { %898 = shalt.err (!%p895_p10)
}
  0x48   : > { %s899_s1 = scalar_lea.vmem %s1204_s10, 128  ;;  %s1033_s7 = smov [#allocation5]  }
  0x49   : > { %p900_p12 = scmp.ne.s32.totalorder %s1204_s10, %s899_s1  ;;  %s904_s12 = sshll.u32 %s1033_s7, 4  ;;  %s905_s12 = int_to_ptr.vmem [resolvable:$false] %s904_s12 }
  0x4a   : > { %s906_s20 = scalar_lea.vmem %s905_s12, 256  ;;  %p907_p9 = scmp.lt.s32.totalorder %s1204_s10, %s905_s12 }
  0x4b   : > { %p902_p1 = pnand %p900_p12, %p1165_p4  ;;  %p908_p2 = scmp.lt.s32.totalorder %s906_s20, %s899_s1 }
  0x4d   : > { %p903_p8 = pneg %p902_p1  ;;  %p909_p6 = por %p908_p2, %p907_p9 }
  0x4f   : > { %p910_p13 = pnand %p909_p6, %p903_p8 }
  0x51   : > { %913 = shalt.err (!%p910_p13)
}
  0x52   : > { %781 = dma.hbm_to_vmem [thread:$0]  (!%p1143_p0), %s1201_s9, 128, %s1204_s10, %s203_s23  }
  0x53   : > { %s244_s19 = scalar_lea.vmem [#allocation10], %s1136_s6  ;;  %s914_s14 = scalar_lea.hbm %s1210_s5, 128 }
  0x54   : > { %s252_s29 = sshll.u32 %s244_s19, 4  ;;  %p915_p11 = scmp.ne.s32.totalorder %s1210_s5, %s914_s14  ;;  %s253_s29 = int_to_ptr.vmem [resolvable:$true] %s252_s29 }
  0x55   : > { %s919_s26 = scalar_lea.hbm %s1348_s2, 256  ;;  %p920_p5 = scmp.lt.u32.totalorder %s1210_s5, %s1348_s2 }
  0x56   : > { %p917_p2 = pnand %p915_p11, %p1165_p4  ;;  %p921_p7 = scmp.lt.u32.totalorder %s919_s26, %s914_s14 }
  0x57   : > { %p923_p12 = scmp.lt.u32.totalorder %s914_s14, %s1210_s5 }
  0x58   : > { %p918_p3 = pneg %p917_p2  ;;  %p922_p10 = por %p921_p7, %p920_p5 }
  0x5a   : > { %p924_p1 = por %p923_p12, %p922_p10 }
  0x5c   : > { %p925_p8 = pnand %p924_p1, %p918_p3 }
  0x5e   : > { %928 = shalt.err (!%p925_p8)
}
  0x5f   : > { %s929_s23 = scalar_lea.vmem %s253_s29, 128  ;;  %s1034_s6 = smov [#allocation10]  }
  0x60   : > { %p930_p9 = scmp.ne.s32.totalorder %s253_s29, %s929_s23  ;;  %s934_s9 = sshll.u32 %s1034_s6, 4  ;;  %s935_s9 = int_to_ptr.vmem [resolvable:$false] %s934_s9 }
  0x61   : > { %s936_s10 = scalar_lea.vmem %s935_s9, 256  ;;  %p937_p11 = scmp.lt.s32.totalorder %s253_s29, %s935_s9 }
  0x62   : > { %p932_p6 = pnand %p930_p9, %p1165_p4  ;;  %p938_p2 = scmp.lt.s32.totalorder %s936_s10, %s929_s23 }
  0x64   : > { %p933_p13 = pneg %p932_p6  ;;  %p939_p0 = por %p938_p2, %p937_p11 }
  0x66   : > { %p940_p5 = pnand %p939_p0, %p933_p13 }
  0x68   : > { %943 = shalt.err (!%p940_p5)
}
  0x69   : > { %p1375_p7 = scmp.ne.s32.totalorder %s1368_s8, 0  ;;  %p1376_p3 = scmp.ne.s32.totalorder %s1373_s24, 0 }
  0x6a   : > { %s1257_s25 = sand.u32 (!%p1376_p3), 1, %s1014_s16   ;;  %p1377_p0 = scmp.ne.s32.totalorder (!%p1376_p3), %s1364_s27, 0 }
  0x6b   : > { %787 = dma.hbm_to_vmem [thread:$0]  (!%p1375_p7), %s1210_s5, 128, %s253_s29, %s1159_s22  }
  0x6c   : > { %274 = sbr.rel (%p1376_p3) target bundleno = 936 (0x3a8), region = 36  ;;  %s1260_s12 = sshll.u32 (!%p1376_p3), %s1257_s25, 3 }
  0x6d   : > { %s277_s20 = scalar_lea.sflag (!%p1376_p3), [#allocation6], %s1257_s25  ;;  %s280_s19 = scalar_lea.vmem (!%p1376_p3), [#allocation5], %s1260_s12 }
  0x73   : > { %997 = dma.done.wait (%p1377_p0), %s277_s20, 128  }
  0x74   : > { %999 = vsyncadd (%p1377_p0), %s277_s20, 4294967168  ;;  %s285_s8 = sand.u32 1, %s1096_s21   ;;  %s289_s24 = scalar_lea.vmem [#allocation8], %s1260_s12 }
  0x75   : > { %s286_s22 = scalar_lea.sflag [#allocation9], %s285_s8 }
  0x76   : > { %1001 = dma.done.wait (%p1377_p0), %s286_s22, 256  }
  0x77   : > { %1003 = vsyncadd (%p1377_p0), %s286_s22, 4294967040  ;;  %vm362_vm0 = vcmask 261120   ;;  %v1035_v0 = vmov 0.0   ;;  %vm1036_vm1 = vmmov 0   ;;  %v365_v1 = vld [vmem:[%s289_s24] sm:$0xff]  ;;  %v364_v2 = vld [vmem:[%s280_s19] sm:$0xff] }
  0x78   : > { %760 = vmatprep.subr.mxu0 %v1035_v0  ;;  %363 = vst.msk [vmem:[#allocation4] sm:$0xff] %vm362_vm0, %v1035_v0  ;;  %762 = vmatprep.mubr.msk.f32.mxu0 %vm1036_vm1, %v1035_v0  ;;  %v1037_v3 = vmov 0   ;;  %vm359_vm2 = vcmask 7168   ;;  %v1038_v4 = vmov -3.4028235e+38   ;;  %p343_p4 = scmp.lt.s32.totalorder %s1022_s18, 1 }
  0x79   : > { %765 = vmatprep.subr.mxu1 %v1035_v0  ;;  %767 = vmatprep.mubr.msk.f32.mxu1 %vm1036_vm1, %v1035_v0  ;;  %360 = vst.msk [vmem:[#allocation2] sm:$0xff] %vm359_vm2, %v1038_v4  ;;  %361 = vst.msk [vmem:[#allocation3] sm:$0xff] %vm359_vm2, %v1035_v0  ;;  %vm451_vm5 = vcmask 64512   ;;  %s298_s11 = scalar_lea.vmem [#allocation10], %s1260_s12  ;;  %s753_s13 = sshll.u32 %s1022_s18, 7 }
  0x7a   : > { %761 = vmatpush3.xpose.msk.msra.mxu0 %vm362_vm0, %v365_v1  ;;  %846 = vset.pattern.permute.xlu0 %v1037_v3  ;;  %s344_s21 = scalar_select %p343_p4, %s1022_s18, 1  ;;  %v475_v17 = vld [vmem:[%s298_s11] sm:$0xff] }
  0x7b   : > { %847 = vset.pattern.permute.xlu1 %v1037_v3  ;;  %766 = vmatpush3.msra.mxu1 %v475_v17  ;;  %s342_s26 = scalar_lea.vmem [#allocation11], %s1260_s12  ;;  %s1296_s6 = scalar_lea.hbm %s1350_s4, %s753_s13 }
  0x7c   : > { %s748_s27 = sshll.u32 %s344_s21, 1  ;;  %s587_s1 = sshll.u32 %s342_s26, 4  ;;  %s1298_s1 = int_to_ptr.vmem [resolvable:$true] %s587_s1 }
  0x7d   : > { %763 = vmatmul.mubr.msk.f32.vlgmr.msra.gmra.mrb[0].mxu0 %vm362_vm0, %v364_v2  ;;  %s352_s14 = scalar_lea.vmem %s1349_s3, %s748_s27  ;;  %s573_s9 = scalar_lea.sflag [#allocation7], %s1257_s25 }
  0x7e   : > { %v444_v5 = vld [vmem:[%s352_s14] sm:$0x3]  ;;  %s944_s10 = scalar_lea.vmem %s1298_s1, 128  ;;  %p1378_p12 = scmp.ne.s32.totalorder %s1365_s28, 0 }
  0x7f   : > { %vm445_vm3 = vnez %v444_v5  ;;  %v549_v31 = vld [vmem:[#allocation4] sm:$0xff]  ;;  %p945_p10 = scmp.ne.s32.totalorder %s1298_s1, %s944_s10  ;;  %s1039_s18 = smov [#allocation11]  }
  0x80   : > { %v446_v6 = vsel %vm445_vm3, 16843009, %v1037_v3  ;;  %v450_v13 = vld [vmem:[#allocation2] sm:$0xff]  ;;  %v467_v25 = vld [vmem:[#allocation3] sm:$0xff]  ;;  %s948_s12 = sshll.u32 %s1039_s18, 4  ;;  %s949_s12 = int_to_ptr.vmem [resolvable:$false] %s948_s12 }
  0x81   : > { %v447_v7 = vunpack.c.0.s8 %v446_v6  ;;  %p946_p1 = pnand %p945_p10, %p1378_p12  ;;  %s950_s20 = scalar_lea.vmem %s949_s12, 256 }
  0x82   : > { %p951_p9 = scmp.lt.s32.totalorder %s1298_s1, %s949_s12  ;;  %p952_p6 = scmp.lt.s32.totalorder %s950_s20, %s944_s10 }
  0x83   : > { %vm448_vm4 = vcmp.ne.s32.totalorder %v447_v7, 0  ;;  %p947_p8 = pneg %p946_p1 }
  0x84   : > { %p953_p13 = por %p952_p6, %p951_p9 }
  0x86   : > { %p954_p11 = pnand %p953_p13, %p947_p8 }
 0x150   : > { %v439_v8 = vpop.f32.mrb[0].mxu0 }
 0x151   : > { %v443_v9 = vmul.f32 0.17677669, %v439_v8  ;;  %v764_v10 = vpop.f32.mrb[1].mxu0 }
 0x153   : > { %v449_v11 = vsel %vm448_vm4, -3.4028235e+38, %v443_v9 }
 0x154   : > { %v452_v12 = vsel %vm451_vm5, %v449_v11, -inf }
 0x155   : > { %453 = vmax.xlane.f32.xlu0 %v452_v12 }
 0x1e2   : > { %v454_v14 = vpop.xlane.xlu0 %453 }
 0x1e3   : > { %v455_v15 = vmax.f32 %v450_v13, %v454_v14 }
 0x1e5   : > { %v456_v16 = vsub.f32 %v450_v13, %v455_v15  ;;  %558 = vst.msk [vmem:[#allocation2] sm:$0xff] %vm359_vm2, %v455_v15  ;;  %461 = vperm.xlu0 %846, %v455_v15  }
 0x1e7   : > { %v457_v23 = vmul.f32 1.442695, %v456_v16 }
 0x264   : > { %v462_v18 = vpop.permute.xlu0 %461 }
 0x265   : > { %v464_v19 = vsub.f32 %v449_v11, %v462_v18 }
 0x267   : > { %v465_v20 = vmul.f32 1.442695, %v464_v19 }
 0x269   : > { %848 = vpow2.f32 %v465_v20 }
 0x26a   : > { %850 = vpow2.f32 %v457_v23 }
 0x273   : > { %v849_v21 = vpop.eup %848 }
 0x274   : > { %768 = vmatmul.mubr.msk.f32.vlgmr.msra.gmra.mrb[0].mxu1 %vm451_vm5, %v849_v21  ;;  %v469_v22 = vsel %vm451_vm5, %v849_v21, 0.0  ;;  %v851_v24 = vpop.eup %850 }
 0x275   : > { %470 = vadd.xlane.f32.xlu1 %v469_v22  ;;  %v468_v26 = vmul.f32 %v851_v24, %v467_v25 }
 0x286   : > { %552 = vperm.xlu1 %847, %v851_v24  }
 0x302   : > { %v471_v27 = vpop.xlane.xlu1 %470 }
 0x303   : > { %v472_v28 = vadd.f32 %v471_v27, %v468_v26 }
 0x305   : > { %474 = vst.msk [vmem:[#allocation3] sm:$0xff] %vm359_vm2, %v472_v28 }
 0x306   : > { %v553_v32 = vpop.permute.xlu1 %552 }
 0x307   : > { %v555_v33 = vmul.f32 %v553_v32, %v549_v31 }
 0x30c   : > { %v562_v29 = vld [vmem:[#allocation3] sm:$0xff] }
 0x30d   : > { %852 = vrcp.f32 %v562_v29 }
 0x317   : > { %v853_v30 = vpop.eup %852 }
 0x318   : > { %567 = vperm.xlu1 %847, %v853_v30  }
 0x347   : > { %v545_v34 = vpop.f32.mrb[0].mxu1 }
 0x348   : > { %v556_v35 = vadd.f32 %v555_v33, %v545_v34  ;;  %v769_v36 = vpop.f32.mrb[1].mxu1 }
 0x34a   : > { %557 = vst.msk [vmem:[#allocation4] sm:$0xff] %vm362_vm0, %v556_v35 }
 0x351   : > { %v564_v37 = vld [vmem:[#allocation4] sm:$0xff] }
 0x397   : > { %v568_v38 = vpop.permute.xlu1 %567 }
 0x398   : > { %v570_v39 = vmul.f32 %v568_v38, %v564_v37 }
 0x39a   : > { %571 = vst.msk [vmem:[%s342_s26] sm:$0xff] %vm362_vm0, %v570_v39 }
 0x39b   : > { %957 = shalt.err (!%p954_p11)
}
 0x39c   : > { %s958_s25 = scalar_lea.hbm %s1296_s6, 128  ;;  %s962_s22 = scalar_lea.hbm %s1350_s4, 256 }
 0x39d   : > { %p959_p2 = scmp.ne.s32.totalorder %s1296_s6, %s958_s25  ;;  %p963_p3 = scmp.lt.u32.totalorder %s1296_s6, %s1350_s4 }
 0x39e   : > { %p964_p0 = scmp.lt.u32.totalorder %s962_s22, %s958_s25  ;;  %p966_p10 = scmp.lt.u32.totalorder %s958_s25, %s1296_s6 }
 0x39f   : > { %p960_p5 = pnand %p959_p2, %p1378_p12 }
 0x3a0   : > { %p965_p4 = por %p964_p0, %p963_p3 }
 0x3a1   : > { %p961_p7 = pneg %p960_p5 }
 0x3a2   : > { %p967_p1 = por %p966_p10, %p965_p4 }
 0x3a4   : > { %p968_p8 = pnand %p967_p1, %p961_p7 }
 0x3a6   : > { %971 = shalt.err (!%p968_p8)
}
 0x3a7   : > { %776 = dma.vmem_to_hbm [thread:$0]  (%p1378_p12), %s1298_s1, 128, %s1296_s6, %s573_s9  }
 0x3a8 PF: > { %s1379_s27 = sld [smem:[#allocation16_spill]]  ;;  %s599_s5 = sand.u32 1, %s1010_s15  }
 0x3a9   : > { %p1380_p9 = scmp.ne.s32.totalorder %s1367_s30, 0  ;;  %s600_s29 = scalar_lea.sflag [#allocation7], %s599_s5 }
 0x3ae   : > { %p1381_p6 = scmp.ge.s32.totalorder %s1379_s27, 2 }
 0x3b0   : > { %p789_p13 = pnand %p1381_p6, %p1380_p9 }
 0x3b2   : > { %1005 = dma.done.wait (!%p789_p13), %s600_s29, 128  }
 0x3b3   : > { %1007 = vsyncadd (!%p789_p13), %s600_s29, 4294967168  ;;  %s23_s20 = sadd.s32 1, %s1379_s27   ;;  %s1382_s28 = sld [smem:[#allocation18_spill]] }
 0x3b4   : > { %p20_p11 = scmp.ge.s32.totalorder %s23_s20, 4   ;;  %s1383_s18 = sld [smem:[#allocation15_spill]] }
 0x3b5   : > { %s1384_s19 = sld [smem:[#allocation17_spill]]  ;;  %s1385_s15 = smov %s1014_s16 }
 0x3b6   : > { %s1386_s16 = smov %s1018_s17  ;;  %22 = sbr.rel (!%p20_p11) target bundleno = 10 (0xa), region = 116 }
 0x3b9   : > { %s1387_s17 = smov %s1382_s28 }
 0x3bd   :  { %605 = vsyncpa [#allocation6], 1 }
 0x3be   :  { %607 = vsyncpa [#allocation6 + $0x1], 1 }
 0x3bf   :  { %608 = vsyncpa [#allocation9], 1 }
 0x3c0   :  { %610 = vsyncpa [#allocation9 + $0x1], 1 }
 0x3c1   :  { %611 = vsyncpa [#allocation7], 1 }
 0x3c2   :  { %613 = vsyncpa [#allocation7 + $0x1], 1 }

</bundles_post_ra>
